<compile_context>
chip_gen: v7x
topology: tpu7x:2x2x1
jax: 0.10.0
libtpu: 0.0.40
codegen_flags: <defaults>
</compile_context>

<pallas_src>
import functools

import jax
import jax.numpy as jnp
from jax.experimental import pallas as pl
from jax.experimental.pallas import tpu as pltpu


def _round_up(x, m):
    return ((x + m - 1) // m) * m


def _vmem_capacity_bytes():
    """Physical VMEM of the current TPU generation (conservative fallback)."""
    try:
        info = pltpu.get_tpu_info()
        cap = int(getattr(info, "vmem_capacity_bytes", 0) or 0)
        if cap > 0:
            return cap
    except Exception:
        pass
    return 64 * 2**20  # assume v7x (smallest VMEM) if the query is unavailable


def _choose_tn(n, tn_max):
    """Column (lane) tile: a multiple of 128 that divides round_up(n, 128).

    Keeps output stores lane-dense and limits boundary masking to <= 127
    columns; never inflates the effective N (the old chooser could ~2x it).
    """
    if n <= 128:
        return n                      # full-dim block
    n128 = _round_up(n, 128)
    t = (min(tn_max, n) // 128) * 128
    while t >= 128:
        if n128 % t == 0:
            return t
        t -= 128
    return 128


def _choose_tm(n, tm_max):
    """Row (sublane) tile: multiple of 8 with <= 12.5% dead rows in the last tile."""
    if n <= 8:
        return n
    t = (min(tm_max, n) // 8) * 8
    while t >= 8:
        if ((-n) % t) * 8 <= n:
            return t
        t -= 8
    return 8


def _tile_vmem_bytes(tm, tn, c_pad, in_itemsize):
    # Double-buffered output + Gram temporary + resident/streaming inputs
    # + (layout-padded) norm tiles.
    return (3 * tm * tn * 4
            + 2 * tm * c_pad * in_itemsize
            + 2 * c_pad * tn * in_itemsize
            + 2 * tm * 128 * 4
            + 2 * 8 * tn * 4)


def _simmat_kernel(f_row_ref, f_colt_ref, s_row_ref, s_col_ref, out_ref):
    # Gram tile on the MXU: (TM, C) x (C, TN) -> (TM, TN), f32 accumulation.
    gram = jax.lax.dot_general(
        f_row_ref[...],
        f_colt_ref[...],
        dimension_numbers=(((1,), (0,)), ((), ())),
        preferred_element_type=jnp.float32,
    )
    # 10*D = s_row + s_col - 20*gram (the 10x is folded into the norms), then
    # ReLU.  4 VPU ops per element.
    out_ref[...] = jnp.maximum(
        s_row_ref[...] + s_col_ref[...] - 20.0 * gram, 0.0
    ).astype(out_ref.dtype)


@functools.partial(jax.jit, static_argnames=("tm_max", "tn_max", "mxu_dtype"))
def simmat_model(fsim, *, tm_max=None, tn_max=None, mxu_dtype=jnp.bfloat16):
    """Pallas equivalent of SimmatModel.forward(Fsim, batch_size).

    mxu_dtype:
      jnp.bfloat16 (default) -- Gram on the MXU with bf16 operands / f32
        accumulation.  Fast on every generation (critical on v5e).  Relative
        error vs the f32 reference is O(2^-8); in particular the diagonal of D
        can be slightly positive instead of exactly 0 after the ReLU.
      jnp.float32 -- bit-faithful to the PyTorch f32 forward (slower on v5e).
    """
    B, N, C = fsim.shape
    cap = _vmem_capacity_bytes()

    # Generation-aware defaults: bigger tiles where VMEM allows (v5e/v6e have
    # 128 MiB; v7x has 64 MiB -> keep the output tile <= ~8 MiB there).
    user_tm = tm_max is not None
    if tm_max is None:
        tm_max = 1024
    if tn_max is None:
        tn_max = 4096 if cap >= 100 * 2**20 else 2048

    tn = _choose_tn(N, tn_max)
    tm_cap = tm_max
    if not user_tm and tn < 512:
        # Awkward N collapsed TN; grow TM so the per-step writeback stays large
        # relative to the ~0.35us per-grid-step overhead.
        tm_cap = min(4096, max(tm_max, (2 * 2**20) // max(tn, 1)))
    tm = _choose_tm(N, tm_cap)

    mxu_dt = jnp.dtype(mxu_dtype)
    isz = mxu_dt.itemsize
    c_pad = _round_up(C, 128)

    # Shrink TM first (never TN, the lane dim of the output store) if the
    # working set would not fit this generation's VMEM.
    while _tile_vmem_bytes(tm, tn, c_pad, isz) > int(0.8 * cap) and tm > 8:
        tm = max(8, (tm // 2) // 8 * 8)

    # Squared norms in f32 with the PyTorch 10x folded in.
    f32 = fsim.astype(jnp.float32)
    s = 10.0 * jnp.sum(f32 * f32, axis=2)            # (B, N)
    s_rows = s[:, :, None]                           # (B, N, 1)
    s_cols = s[:, None, :]                           # (B, 1, N)

    # MXU operands: cast + zero-pad C to a lane multiple (exact for the Gram),
    # and pre-transpose the column operand so the kernel runs a canonical
    # (TM, C) x (C, TN) matmul with no in-kernel transpose.
    f_mm = fsim.astype(mxu_dt)
    if c_pad != C:
        f_mm = jnp.pad(f_mm, ((0, 0), (0, 0), (0, c_pad - C)))
    f_rows = f_mm                                    # (B, N, Cp)
    f_colt = jnp.swapaxes(f_mm, 1, 2)                # (B, Cp, N)

    gi, gj = pl.cdiv(N, tm), pl.cdiv(N, tn)
    grid = (B, gi, gj)

    vmem_limit = int(min(int(0.9 * cap),
                         max(32 * 2**20,
                             2 * _tile_vmem_bytes(tm, tn, c_pad, isz))))

    cost = pl.CostEstimate(
        flops=2 * B * (gi * tm) * (gj * tn) * c_pad,
        transcendentals=0,
        bytes_accessed=int(B * (4 * N * N                     # output writeback
                                + (gi + 1) * N * c_pad * isz  # rows once + cols per stripe
                                + (gi + 1) * N * 4)),         # norm vectors
    )

    return pl.pallas_call(
        _simmat_kernel,
        out_shape=jax.ShapeDtypeStruct((B, N, N), jnp.float32),
        grid=grid,
        in_specs=[
            pl.BlockSpec((None, tm, c_pad), lambda b, i, j: (b, i, 0)),  # row block (resident over j)
            pl.BlockSpec((None, c_pad, tn), lambda b, i, j: (b, 0, j)),  # col block (streams)
            pl.BlockSpec((None, tm, 1), lambda b, i, j: (b, i, 0)),      # 10*r rows
            pl.BlockSpec((None, 1, tn), lambda b, i, j: (b, 0, j)),      # 10*r cols
        ],
        out_specs=pl.BlockSpec((None, tm, tn), lambda b, i, j: (b, i, j)),
        compiler_params=pltpu.CompilerParams(
            dimension_semantics=("parallel", "parallel", "parallel"),
            vmem_limit_bytes=vmem_limit,
        ),
        cost_estimate=cost,
    )(f_rows, f_colt, s_rows, s_cols)


def _simmat_reference(fsim, gram_dtype=jnp.float32):
    # Pure-JAX reference mirroring the PyTorch code; gram_dtype lets us build a
    # "matched" reference for the bf16-MXU path.
    f = fsim.astype(jnp.float32)
    r = jnp.sum(f * f, axis=2)[:, :, None]
    fg = fsim.astype(gram_dtype)
    gram = jnp.einsum("bnc,bmc->bnm", fg, fg,
                      preferred_element_type=jnp.float32).astype(jnp.float32)
    d = r - 2.0 * gram + jnp.transpose(r, (0, 2, 1))
    return jnp.maximum(10.0 * d, 0.0)


if __name__ == "__main__":
    # SimmatModel has no parameters; deterministic small inputs.
    B, N, C = 2, 16, 8
    fsim = jax.random.normal(jax.random.PRNGKey(0), (B, N, C), dtype=jnp.float32)
    ref = _simmat_reference(fsim)

    # (A) f32-Gram path: faithful to the PyTorch f32 forward.
    out_f32 = jax.block_until_ready(simmat_model(fsim, mxu_dtype=jnp.float32))
    assert out_f32.shape == (B, N, N)
    assert jnp.allclose(out_f32, ref, atol=1e-3, rtol=1e-4), "f32 path mismatch"

    # (B) default bf16-Gram path: tight vs a bf16-Gram reference; loose vs the
    #     pure f32 reference (documents the bf16 MXU tolerance).
    out_bf = jax.block_until_ready(simmat_model(fsim))
    ref_bf = _simmat_reference(fsim, gram_dtype=jnp.bfloat16)
    assert jnp.allclose(out_bf, ref_bf, atol=5e-3, rtol=1e-3), "bf16 path mismatch"
    scale = float(jnp.max(jnp.abs(ref))) + 1.0
    assert float(jnp.max(jnp.abs(out_bf - ref))) <= 3e-2 * scale, "bf16 vs f32 too far"

    # (C) non-aligned N with small tiles: exercises masked boundary tiles on
    #     both the row (sublane) and column (lane) axes of the output, with no
    #     padding of N and no post-kernel slice.
    B2, N2, C2 = 2, 200, 32
    fsim2 = jax.random.normal(jax.random.PRNGKey(1), (B2, N2, C2), dtype=jnp.float32)
    out2 = jax.block_until_ready(
        simmat_model(fsim2, tm_max=64, tn_max=128, mxu_dtype=jnp.float32))
    ref2 = _simmat_reference(fsim2)
    assert out2.shape == (B2, N2, N2)
    assert jnp.allclose(out2, ref2, atol=1e-3, rtol=1e-3), "boundary-tile mismatch"

    print("KERNEL_OK")
</pallas_src>

<mosaic_0001>
module attributes {stable_mosaic.version = 11 : i64} {
  func.func @_simmat_kernel(%arg0: i32, %arg1: i32, %arg2: i32, %arg3: memref<1x16x128xf32, #tpu.memory_space<vmem>>, %arg4: memref<1x128x16xf32, #tpu.memory_space<vmem>>, %arg5: memref<1x16x1xf32, #tpu.memory_space<vmem>>, %arg6: memref<1x1x16xf32, #tpu.memory_space<vmem>>, %arg7: memref<1x16x16xf32, #tpu.memory_space<vmem>>) attributes {dimension_semantics = [#tpu.dimension_semantics<parallel>, #tpu.dimension_semantics<parallel>, #tpu.dimension_semantics<parallel>], iteration_bounds = array<i64: 2, 1, 1>, scalar_prefetch = 0 : i64, scratch_operands = 0 : i64, tpu.core_type = #tpu.core_type<tc>, window_params = [{transform_indices = @transform_0, window_bounds = array<i64: 1, 16, 128>}, {transform_indices = @transform_1, window_bounds = array<i64: 1, 128, 16>}, {transform_indices = @transform_2, window_bounds = array<i64: 1, 16, 1>}, {transform_indices = @transform_3, window_bounds = array<i64: 1, 1, 16>}, {transform_indices = @transform_4, window_bounds = array<i64: 1, 16, 16>}]} {
    %c0 = arith.constant 0 : index
    %c0_0 = arith.constant 0 : index
    %c0_1 = arith.constant 0 : index
    %0 = vector.load %arg3[%c0, %c0_0, %c0_1] : memref<1x16x128xf32, #tpu.memory_space<vmem>>, vector<1x16x128xf32>
    %1 = vector.shape_cast %0 : vector<1x16x128xf32> to vector<16x128xf32>
    %c0_2 = arith.constant 0 : index
    %c0_3 = arith.constant 0 : index
    %c0_4 = arith.constant 0 : index
    %2 = vector.load %arg4[%c0_2, %c0_3, %c0_4] : memref<1x128x16xf32, #tpu.memory_space<vmem>>, vector<1x128x16xf32>
    %3 = vector.shape_cast %2 : vector<1x128x16xf32> to vector<128x16xf32>
    %cst = arith.constant dense<0.000000e+00> : vector<16x16xf32>
    %4 = tpu.matmul %1, %3, %cst {dimension_numbers = #tpu.dot_dimension_numbers<[1], [0], [0], [1], [0, 0, 1, 1], [], []>} : vector<16x128xf32>, vector<128x16xf32>, vector<16x16xf32> -> vector<16x16xf32>
    %c0_5 = arith.constant 0 : index
    %c0_6 = arith.constant 0 : index
    %c0_7 = arith.constant 0 : index
    %5 = vector.load %arg5[%c0_5, %c0_6, %c0_7] : memref<1x16x1xf32, #tpu.memory_space<vmem>>, vector<1x16x1xf32>
    %6 = vector.shape_cast %5 : vector<1x16x1xf32> to vector<16x1xf32>
    %c0_8 = arith.constant 0 : index
    %c0_9 = arith.constant 0 : index
    %c0_10 = arith.constant 0 : index
    %7 = vector.load %arg6[%c0_8, %c0_9, %c0_10] : memref<1x1x16xf32, #tpu.memory_space<vmem>>, vector<1x1x16xf32>
    %8 = vector.shape_cast %7 : vector<1x1x16xf32> to vector<1x16xf32>
    %9 = vector.broadcast %6 : vector<16x1xf32> to vector<16x16xf32>
    %10 = vector.broadcast %8 : vector<1x16xf32> to vector<16x16xf32>
    %11 = arith.addf %9, %10 : vector<16x16xf32>
    %cst_11 = arith.constant 2.000000e+01 : f32
    %12 = vector.broadcast %cst_11 : f32 to vector<16x16xf32>
    %13 = arith.mulf %12, %4 : vector<16x16xf32>
    %14 = arith.subf %11, %13 : vector<16x16xf32>
    %cst_12 = arith.constant 0.000000e+00 : f32
    %15 = vector.broadcast %cst_12 : f32 to vector<16x16xf32>
    %16 = arith.maximumf %14, %15 : vector<16x16xf32>
    %c0_13 = arith.constant 0 : index
    %c0_14 = arith.constant 0 : index
    %c0_15 = arith.constant 0 : index
    %17 = vector.load %arg7[%c0_13, %c0_14, %c0_15] : memref<1x16x16xf32, #tpu.memory_space<vmem>>, vector<1x16x16xf32>
    %18 = vector.shape_cast %17 : vector<1x16x16xf32> to vector<16x16xf32>
    %19 = vector.shape_cast %16 : vector<16x16xf32> to vector<1x16x16xf32>
    tpu.vector_store %arg7[%c0_13, %c0_14, %c0_15], %19 {strides = array<i32>} : memref<1x16x16xf32, #tpu.memory_space<vmem>>, vector<1x16x16xf32>,
    return
  }
  func.func @transform_0(%arg0: i32, %arg1: i32, %arg2: i32) -> (i32, i32, i32) {
    %c0_i32 = arith.constant 0 : i32
    %c0_i32_0 = arith.constant 0 : i32
    return %arg0, %arg1, %c0_i32 : i32, i32, i32
  }
  func.func @transform_1(%arg0: i32, %arg1: i32, %arg2: i32) -> (i32, i32, i32) {
    %c0_i32 = arith.constant 0 : i32
    %c0_i32_0 = arith.constant 0 : i32
    return %arg0, %c0_i32, %arg2 : i32, i32, i32
  }
  func.func @transform_2(%arg0: i32, %arg1: i32, %arg2: i32) -> (i32, i32, i32) {
    %c0_i32 = arith.constant 0 : i32
    %c0_i32_0 = arith.constant 0 : i32
    return %arg0, %arg1, %c0_i32 : i32, i32, i32
  }
  func.func @transform_3(%arg0: i32, %arg1: i32, %arg2: i32) -> (i32, i32, i32) {
    %c0_i32 = arith.constant 0 : i32
    %c0_i32_0 = arith.constant 0 : i32
    return %arg0, %c0_i32, %arg2 : i32, i32, i32
  }
  func.func @transform_4(%arg0: i32, %arg1: i32, %arg2: i32) -> (i32, i32, i32) {
    %c0_i32 = arith.constant 0 : i32
    return %arg0, %arg1, %arg2 : i32, i32, i32
  }
}

</mosaic_0001>

<bundles_post_ra>
// kernel: simmat_model.1
= control target key start
LH: loop header
LB: loop body
LE: loop exit
PB: predicated region body
PF: predicated region fallthrough
CT: control target
= control target key end

     0   :  { %9 = vsyncpa [#allocation3], 0  ;;  %s1025_s0 = inlined_call_operand.vmem [shape: f32[2,16,128], index: 0, kind: input, shape index: {}]   ;;  %s1026_s1 = inlined_call_operand.vmem [shape: f32[2,128,16], index: 1, kind: input, shape index: {}]   ;;  %s1027_s2 = inlined_call_operand.vmem [shape: f32[2,16,1], index: 2, kind: input, shape index: {}]   ;;  %s1028_s3 = inlined_call_operand.vmem [shape: f32[2,1,16], index: 3, kind: input, shape index: {}]   ;;  %s1029_s4 = inlined_call_operand.hbm [shape: f32[2,16,16], index: 4, kind: output, shape index: {}]  }
   0x1   :  { %11 = vsyncpa [#allocation3 + $0x1], 0  ;;  %s874_s15 = smov 0   ;;  %s876_s16 = smov 0  }
   0x2   :  { %s878_s17 = smov 0   ;;  %s880_s18 = smov 0  }
   0x3   :  { %s882_s19 = smov 0   ;;  %s884_s20 = smov 0  }
   0x4 LB: > { %s599_s21 = sadd.s32 4294967295, %s843_s20   ;;  %s600_s22 = sadd.s32 4294967294, %s843_s20   ;;  %s843_s20 = sphi %s884_s20, %s17_s20   ;;  %s839_s19 = sphi %s882_s19, %s1036_s19   ;;  %s835_s18 = sphi %s880_s18, %s1035_s18   ;;  %s831_s17 = sphi %s878_s17, %s1034_s17   ;;  %s827_s16 = sphi %s876_s16, %s1033_s16   ;;  %s823_s15 = sphi %s874_s15, %s1032_s15  }
   0x5   : > { %s36_s23 = sadd.s32 1, %s839_s19  ;;  %s159_s24 = sadd.s32 1, %s831_s17 }
   0x6   : > { %p38_p0 = scmp.ge.s32.totalorder %s36_s23, 2  ;;  %p169_p1 = scmp.ne.s32.totalorder %s831_s17, %s827_s16 }
   0x7   : > { %p170_p2 = scmp.eq.s32.totalorder %s599_s21, 1  ;;  %p175_p3 = scmp.ne.s32.totalorder %s827_s16, %s823_s15 }
   0x8   : > { %s1038_s23 = smov (%p38_p0, %s36_s23), 0  ;;  %p176_p5 = scmp.eq.s32.totalorder %s600_s22, 1 }
   0x9   : > { %p914_p4 = por %p170_p2, %p169_p1  ;;  %s152_s26 = ssub.s32 %s839_s19, %s1038_s23 }
   0xa   : > { %p603_p6 = scmp.ge.s32.totalorder %s843_s20, 1  ;;  %p157_p7 = scmp.eq.s32.totalorder %s152_s26, 0 }
   0xb   : > { %p921_p8 = por %p176_p5, %p175_p3  ;;  %p240_p9 = scmp.lt.s32.totalorder %s843_s20, 3 }
   0xc   : > { %s927_s28 = scalar_select %p157_p7, %s831_s17, %s159_s24  }
   0xd   : > { %p241_p10 = pnand %p603_p6, %p240_p9 }
   0xe   : > { %p294_p11 = scmp.lt.s32.totalorder (!%p241_p10), %s835_s18, 1  ;;  %v845_v0 = vmov (!%p241_p10), 0   ;;  %s290_s21 = sand.u32 (!%p241_p10), 1, %s827_s16   ;;  %vm448_vm0 = vcmask (!%p241_p10), 130048  }
   0xf   : > { %244 = sbr.rel (%p241_p10) target bundleno = 295 (0x127), region = 36  ;;  %764 = vset.pattern.permute.xlu0 (!%p241_p10), %v845_v0  ;;  %s620_s5 = sshll.u32 (!%p241_p10), %s835_s18, 8 }
  0x16   : > { %s931_s29 = scalar_select %p294_p11, %s835_s18, 1 }
  0x17   : > { %s979_s18 = scalar_lea.sflag [#allocation3], %s290_s21 }
  0x18   : > { %s618_s30 = sshll.u32 %s931_s29, 7  ;;  %s617_s8 = sshll.u32 %s931_s29, 4 }
  0x19   : > { %s937_s7 = scalar_lea.vmem %s1026_s1, %s618_s30  ;;  %s949_s11 = scalar_lea.vmem %s1025_s0, %s617_s8 }
  0x1a   : > { %v330_v1 = vld [vmem:[%s937_s7] sm:$0xff]  ;;  %v331_v2 = vld [vmem:[%s937_s7 + $0x8] sm:$0xff]  ;;  %v332_v3 = vld [vmem:[%s937_s7 + $0x10] sm:$0xff]  ;;  %s319_s14 = scalar_lea.vmem %s1027_s2, %s617_s8  ;;  %s326_s26 = scalar_lea.vmem %s1028_s3, %s931_s29 }
  0x1b   : > { %v674_v4 = vpack.c.bf16 %v331_v2, %v330_v1  ;;  %v333_v5 = vld [vmem:[%s937_s7 + $0x18] sm:$0xff]  ;;  %v334_v7 = vld [vmem:[%s937_s7 + $0x20] sm:$0xff]  ;;  %v335_v8 = vld [vmem:[%s937_s7 + $0x28] sm:$0xff]  ;;  %s604_s30 = sshll.u32 %s290_s21, 4  ;;  %s975_s29 = scalar_lea.hbm %s1029_s4, %s620_s5 }
  0x1c   : > { %v678_v6 = vpack.c.bf16 %v333_v5, %v332_v3  ;;  %v682_v9 = vpack.c.bf16 %v335_v8, %v334_v7  ;;  %v328_v10 = vld [vmem:[%s949_s11] sm:$0xff]  ;;  %v336_v11 = vld [vmem:[%s937_s7 + $0x30] sm:$0xff]  ;;  %v337_v12 = vld [vmem:[%s937_s7 + $0x38] sm:$0xff]  ;;  %s292_s6 = scalar_lea.vmem [#allocation2], %s604_s30 }
  0x1d   : > { %675 = vmatprep.subr.bf16.mxu0 %v674_v4  ;;  %671 = vmatprep.mubr.f32.mxu0 %v328_v10  ;;  %v421_v13 = vld [vmem:[%s319_s14] sm:$0xff]  ;;  %v422_v14 = vld [vmem:[%s319_s14 + $0x8] sm:$0xff]  ;;  %v686_v15 = vpack.c.bf16 %v337_v12, %v336_v11  ;;  %v340_v19 = vld [vmem:[%s937_s7 + $0x50] sm:$0xff] }
  0x1e   : > { %677 = vmatpush3.bf16.msra.mxu0 %v674_v4  ;;  %426 = vperm.xlu0 %764, %v421_v13   ;;  %v338_v16 = vld [vmem:[%s937_s7 + $0x40] sm:$0xff]  ;;  %v339_v17 = vld [vmem:[%s937_s7 + $0x48] sm:$0xff]  ;;  %v341_v20 = vld [vmem:[%s937_s7 + $0x58] sm:$0xff] }
  0x1f   : > { %679 = vmatprep.subr.bf16.mxu0 %v678_v6  ;;  %v690_v18 = vpack.c.bf16 %v339_v17, %v338_v16  ;;  %v694_v21 = vpack.c.bf16 %v341_v20, %v340_v19  ;;  %v342_v22 = vld [vmem:[%s937_s7 + $0x60] sm:$0xff]  ;;  %v343_v23 = vld [vmem:[%s937_s7 + $0x68] sm:$0xff]  ;;  %v344_v25 = vld [vmem:[%s937_s7 + $0x70] sm:$0xff] }
  0x20   : > { %v698_v24 = vpack.c.bf16 %v343_v23, %v342_v22  ;;  %v345_v26 = vld [vmem:[%s937_s7 + $0x78] sm:$0xff]  ;;  %v329_v28 = vld [vmem:[%s949_s11 + $0x8] sm:$0xff]  ;;  %v611_v30 = vld [vmem:[%s326_s26] ss:$0 sm:$0xff]  ;;  %s468_s7 = sshll.u32 %s292_s6, 4  ;;  %s846_s11 = smov [#allocation2]   ;;  %s977_s7 = int_to_ptr.vmem [resolvable:$true] %s468_s7 }
  0x21   : > { %v702_v27 = vpack.c.bf16 %v345_v26, %v344_v25  ;;  %s765_s10 = scalar_lea.vmem %s977_s7, 256  ;;  %s769_s12 = sshll.u32 %s846_s11, 4  ;;  %s770_s12 = int_to_ptr.vmem [resolvable:$false] %s769_s12 }
  0x22   : > { %681 = vmatpush3.bf16.msra.mxu0 %v678_v6  ;;  %431 = vperm.xlu0 %764, %v422_v14   ;;  %p766_p12 = scmp.ne.s32.totalorder %s977_s7, %s765_s10  ;;  %s771_s13 = scalar_lea.vmem %s770_s12, 512 }
  0x23   : > { %683 = vmatprep.subr.bf16.mxu0 %v682_v9  ;;  %p772_p1 = scmp.lt.s32.totalorder %s977_s7, %s770_s12  ;;  %p773_p2 = scmp.lt.s32.totalorder %s771_s13, %s765_s10 }
  0x24   : > { %p767_p13 = pnand %p766_p12, %p914_p4 }
  0x25   : > { %p774_p3 = por %p773_p2, %p772_p1 }
  0x26   : > { %685 = vmatpush3.bf16.msra.mxu0 %v682_v9  ;;  %p768_p0 = pneg %p767_p13 }
  0x27   : > { %687 = vmatprep.subr.bf16.mxu0 %v686_v15 }
  0x28   : > { %p775_p5 = pnand %p774_p3, %p768_p0 }
  0x2a   : > { %689 = vmatpush3.bf16.msra.mxu0 %v686_v15 }
  0x2b   : > { %691 = vmatprep.subr.bf16.mxu0 %v690_v18 }
  0x2e   : > { %693 = vmatpush3.bf16.msra.mxu0 %v690_v18 }
  0x2f   : > { %695 = vmatprep.subr.bf16.mxu0 %v694_v21 }
  0x32   : > { %697 = vmatpush3.bf16.msra.mxu0 %v694_v21 }
  0x33   : > { %699 = vmatprep.subr.bf16.mxu0 %v698_v24 }
  0x36   : > { %701 = vmatpush3.bf16.msra.mxu0 %v698_v24 }
  0x37   : > { %703 = vmatprep.subr.bf16.mxu0 %v702_v27 }
  0x3a   : > { %705 = vmatpush3.bf16.msra.mxu0 %v702_v27 }
  0x3d   : > { %672 = vmatmul.mubr.f32.vlgmr.msra.gmra.mrb[0].mxu0 %v329_v28 }
  0x9d   : > { %v427_v29 = vpop.permute.xlu0 %426 }
  0x9e   : > { %v440_v36 = vadd.f32 %v611_v30, %v427_v29 }
  0xa1   : > { %v432_v31 = vpop.permute.xlu0 %431 }
  0xa2   : > { %v441_v33 = vadd.f32 %v611_v30, %v432_v31 }
 0x110   : > { %v673_v32 = vpop.f32.mrb[0].mxu0 }
 0x111   : > { %v443_v34 = vmul.f32 20.0, %v673_v32  ;;  %v412_v35 = vpop.f32.mrb[1].mxu0 }
 0x112   : > { %v442_v37 = vmul.f32 20.0, %v412_v35 }
 0x113   : > { %v445_v38 = vsub.f32 %v441_v33, %v443_v34 }
 0x114   : > { %v444_v39 = vsub.f32 %v440_v36, %v442_v37 }
 0x115   : > { %v447_v40 = vmax.f32 %v445_v38, 0.0 }
 0x116   : > { %v446_v41 = vmax.f32 %v444_v39, 0.0 }
 0x117   : > { %450 = vst.msk [vmem:[%s292_s6 + $0x8] sm:$0xff] %vm448_vm0, %v447_v40 }
 0x118   : > { %449 = vst.msk [vmem:[%s292_s6] sm:$0xff] %vm448_vm0, %v446_v41 }
 0x119   : > { %778 = shalt.err (!%p775_p5)
}
 0x11a   : > { %s779_s14 = scalar_lea.hbm %s975_s29, 256  ;;  %s783_s24 = scalar_lea.hbm %s1029_s4, 512 }
 0x11b   : > { %p780_p6 = scmp.ne.s32.totalorder %s975_s29, %s779_s14  ;;  %p784_p10 = scmp.lt.u32.totalorder %s975_s29, %s1029_s4 }
 0x11c   : > { %p785_p11 = scmp.lt.u32.totalorder %s783_s24, %s779_s14  ;;  %p787_p13 = scmp.lt.u32.totalorder %s779_s14, %s975_s29 }
 0x11d   : > { %p781_p7 = pnand %p780_p6, %p914_p4 }
 0x11e   : > { %p786_p12 = por %p785_p11, %p784_p10 }
 0x11f   : > { %p782_p9 = pneg %p781_p7 }
 0x120   : > { %p788_p0 = por %p787_p13, %p786_p12 }
 0x122   : > { %p789_p1 = pnand %p788_p0, %p782_p9 }
 0x124   : > { %792 = shalt.err (!%p789_p1)
}
 0x125   : > { %s847_s5 = smov 128   ;;  %s848_s6 = smov 8  }
 0x126   : > { %706 = dma.vmem_to_hbm [thread:$0]  (%p914_p4), %s977_s7, 256, %s975_s29, %s979_s18, %s847_s5, %s847_s5, %s848_s6  }
 0x127 PF: > { %p712_p2 = scmp.ge.s32.totalorder %s843_s20, 2  ;;  %s483_s8 = sand.u32 1, %s823_s15  }
 0x128   : > { %s484_s9 = scalar_lea.sflag [#allocation3], %s483_s8 }
 0x129   : > { %p709_p3 = pnand %p712_p2, %p921_p8 }
 0x12b   : > { %818 = dma.done.wait (!%p709_p3), %s484_s9, 256  }
 0x12c   : > { %820 = vsyncadd (!%p709_p3), %s484_s9, 4294967040  ;;  %s17_s20 = sadd.s32 1, %s843_s20   ;;  %s1032_s15 = smov %s827_s16 }
 0x12d   : > { %p14_p5 = scmp.ge.s32.totalorder %s17_s20, 4   ;;  %s1033_s16 = smov %s831_s17 }
 0x12e   : > { %s1034_s17 = smov %s927_s28  ;;  %s1035_s18 = smov %s839_s19 }
 0x12f   : > { %s1036_s19 = smov %s1038_s23  ;;  %16 = sbr.rel (!%p14_p5) target bundleno = 4 (0x4), region = 80 }
 0x136   :  { %489 = vsyncpa [#allocation3], 1 }
 0x137   :  { %491 = vsyncpa [#allocation3 + $0x1], 1 }

</bundles_post_ra>
